<compile_context>
chip_gen: v7x
topology: tpu7x:2x2x1
jax: 0.10.0
libtpu: 0.0.40
codegen_flags: <defaults>
</compile_context>

<pallas_src>
import math

import jax
import jax.numpy as jnp
from jax.experimental import pallas as pl
from jax.experimental.pallas import tpu as pltpu


_NEG_INF = -9.0e15  # matches the torch reference's zero_vec


def _round_up(v: int, m: int) -> int:
    return (v + m - 1) // m * m


def _tile_and_pad(size: int, max_tile: int):
    """Tile = min(max_tile, round_up(size, 128)); pad size UP to a tile multiple."""
    tile = min(max_tile, _round_up(max(size, 1), 128))
    return tile, _round_up(size, tile)


def _vmem_limit_bytes() -> int:
    """Generation-aware scoped-VMEM budget (~96 MiB on v5e/v6e, 48 MiB on v7x)."""
    try:
        cap = pltpu.get_tpu_info().vmem_capacity_bytes
    except Exception:
        cap = 64 * 1024 * 1024
    return int(min(100 * 1024 * 1024, cap * 3 // 4))


def _score_dtype():
    """bf16 score chain on v6e/v7x (bf16 VPU/EUP); f32 on v5 and older."""
    try:
        kind = jax.devices()[0].device_kind.lower()
    except Exception:
        return jnp.float32
    if any(v in kind for v in ("v2", "v3", "v4", "v5")):
        return jnp.float32
    return jnp.bfloat16


# ---------------------------------------------------------------------------
# Stage 1: h = x @ W  and packed attention projections f = h @ [a1 | a2 | 0..]
# ---------------------------------------------------------------------------
def _proj_kernel(x_ref, w_ref, a_ref, h_ref, f_ref):
    # x_ref : (tn, F_in_pad)        bf16 node features (rows = flattened B*N)
    # w_ref : (F_in_pad, F_out_pad) bf16 weight
    # a_ref : (F_out_pad, 128)      bf16, col 0 = a1, col 1 = a2, rest zero
    # h_ref : (tn, F_out_pad)       bf16 output projection
    # f_ref : (tn, 128)             f32, col 0 = h.a1, col 1 = h.a2 (lane-dense)
    h = jnp.dot(x_ref[...], w_ref[...], preferred_element_type=jnp.float32)
    h_b = h.astype(jnp.bfloat16)
    h_ref[...] = h_b
    f_ref[...] = jnp.dot(h_b, a_ref[...], preferred_element_type=jnp.float32)


# ---------------------------------------------------------------------------
# Stage 2: tiled attention with online softmax + empty-adjacency-tile skipping
# ---------------------------------------------------------------------------
def _make_attn_kernel(alpha: float, concat: bool, score_dtype):
    def attn_kernel(bmap_ref, fq_ref, fk_ref, adj_ref, h_ref, out_ref,
                    m_ref, l_ref, acc_ref):
        # bmap_ref: (B*nq*nk,) int32 SMEM  -- 1 if the (b,qi,ki) tile has edges
        # fq_ref  : (1, tq, 128)  f32, col 0 = h_i . a1   (query rows)
        # fk_ref  : (1, 128, tk)  f32, row 1 = h_j . a2   (pre-transposed keys)
        # adj_ref : (1, tq, tk)   int8 adjacency mask
        # h_ref   : (1, tk, F_out_pad) bf16 projected neighbor features
        # out_ref : (1, tq, F_out_pad) bf16 output (written on last k tile)
        # scratch : m (tq,1), l (tq,1), acc (tq,F_out_pad)  f32 online softmax
        b, qi, ki = pl.program_id(0), pl.program_id(1), pl.program_id(2)
        nq, nk = pl.num_programs(1), pl.num_programs(2)

        @pl.when(ki == 0)
        def _init():
            m_ref[...] = jnp.full_like(m_ref, -jnp.inf)
            l_ref[...] = jnp.zeros_like(l_ref)
            acc_ref[...] = jnp.zeros_like(acc_ref)

        has_edges = bmap_ref[(b * nq + qi) * nk + ki] > 0

        @pl.when(has_edges)
        def _tile():
            f1 = fq_ref[0, :, 0:1].astype(score_dtype)       # (tq, 1): a1 . h_i
            f2 = fk_ref[0, 1:2, :].astype(score_dtype)       # (1, tk): a2 . h_j
            e = f1 + f2                                      # (tq, tk) raw logits
            e = jnp.where(e > 0, e, alpha * e)               # LeakyReLU
            e = jnp.where(adj_ref[0] > 0, e, _NEG_INF)       # adjacency mask

            m_prev = m_ref[...]                              # f32
            e_max = jnp.max(e, axis=-1, keepdims=True).astype(jnp.float32)
            m_new = jnp.maximum(m_prev, e_max)
            scale = jnp.exp(m_prev - m_new)                  # f32 (tq, 1)
            p = jnp.exp(e - m_new.astype(score_dtype))       # (tq, tk) score dtype
            l_ref[...] = scale * l_ref[...] + jnp.sum(
                p.astype(jnp.float32), axis=-1, keepdims=True)
            acc_ref[...] = scale * acc_ref[...] + jnp.dot(
                p.astype(jnp.bfloat16), h_ref[0],
                preferred_element_type=jnp.float32)
            m_ref[...] = m_new

        @pl.when(ki == nk - 1)
        def _finalize():
            # TODO(synk): F.dropout on the attention weights is a no-op here
            # (eval mode); a training version would draw pltpu.prng_* bits.
            l = l_ref[...]
            l_safe = jnp.where(l > 0.0, l, 1.0)   # rows whose tiles were all skipped
            h_prime = acc_ref[...] * pl.reciprocal(l_safe, approx=True)
            if concat:
                # ELU(x) = x if x > 0 else exp(x) - 1
                h_prime = jnp.where(h_prime > 0, h_prime, jnp.exp(h_prime) - 1.0)
            out_ref[0] = h_prime.astype(out_ref.dtype)

    return attn_kernel


# ---------------------------------------------------------------------------
# Adjacency preparation (hoist + reuse across heads / layers)
# ---------------------------------------------------------------------------
def prepare_adjacency(adj, n_pad: int, tile: int):
    """(adj > 0) -> int8, zero-padded to (B, n_pad, n_pad), plus a flattened
    per-(b, q-block, k-block) int32 "block has edges" bitmap for scalar
    prefetch.  Build once and reuse for every head/layer sharing this graph."""
    B, N, _ = adj.shape
    adj_p = jnp.zeros((B, n_pad, n_pad), jnp.int8)
    adj_p = adj_p.at[:, :N, :N].set((adj > 0).astype(jnp.int8))
    nb = n_pad // tile
    blocks = adj_p.reshape(B, nb, tile, nb, tile)
    bitmap = (jnp.max(blocks, axis=(2, 4)) > 0).astype(jnp.int32).reshape(-1)
    return adj_p, bitmap


# ---------------------------------------------------------------------------
# Wrapper
# ---------------------------------------------------------------------------
def gat_forward(x, adj, W, a, *, alpha=0.2, concat=True, max_tile=1024,
                adj_prepared=None):
    """GraphAttentionLayer forward (eval mode).

    x   : (B, N, F_in) float32
    adj : (B, N, N)    numeric (entries > 0 are edges)
    W   : (F_in, F_out)
    a   : (2*F_out, 1)
    adj_prepared : optional output of prepare_adjacency(adj, N_pad, tile)
                   built with the same max_tile (hoist across heads/layers).
    Returns (B, N, F_out) bfloat16 (kernel writes back bf16 to halve traffic).
    """
    B, N, F_in = x.shape
    F_out = W.shape[1]

    tile, N_pad = _tile_and_pad(N, max_tile)     # pad N up; never shrink tiles
    tq = tk = tile
    F_in_pad = _round_up(F_in, 128)
    F_out_pad = _round_up(F_out, 128)
    vmem_limit = _vmem_limit_bytes()
    score_dtype = _score_dtype()

    # ---- operand prep (adjacency part is hoistable via adj_prepared) -------
    if adj_prepared is None:
        adj_prepared = prepare_adjacency(adj, N_pad, tile)
    adj_p, bitmap = adj_prepared

    x_p = jnp.zeros((B, N_pad, F_in_pad), jnp.bfloat16)
    x_p = x_p.at[:, :N, :F_in].set(x.astype(jnp.bfloat16))
    W_p = jnp.zeros((F_in_pad, F_out_pad), jnp.bfloat16)
    W_p = W_p.at[:F_in, :F_out].set(W.astype(jnp.bfloat16))
    a_pack = jnp.zeros((F_out_pad, 128), jnp.bfloat16)
    a_pack = a_pack.at[:F_out, 0].set(a[:F_out, 0].astype(jnp.bfloat16))
    a_pack = a_pack.at[:F_out, 1].set(a[F_out:, 0].astype(jnp.bfloat16))

    # ---- stage 1: one big projection over all B*N_pad rows -----------------
    rows = B * N_pad
    tn, rows_pad = _tile_and_pad(rows, 1024)
    x_flat = x_p.reshape(rows, F_in_pad)
    if rows_pad > rows:
        x_flat = jnp.concatenate(
            [x_flat, jnp.zeros((rows_pad - rows, F_in_pad), x_flat.dtype)], axis=0)

    h_flat, f_flat = pl.pallas_call(
        _proj_kernel,
        out_shape=(
            jax.ShapeDtypeStruct((rows_pad, F_out_pad), jnp.bfloat16),
            jax.ShapeDtypeStruct((rows_pad, 128), jnp.float32),
        ),
        grid_spec=pltpu.PrefetchScalarGridSpec(
            num_scalar_prefetch=0,
            grid=(rows_pad // tn,),
            in_specs=[
                pl.BlockSpec((tn, F_in_pad), lambda i: (i, 0)),
                pl.BlockSpec((F_in_pad, F_out_pad), lambda i: (0, 0)),
                pl.BlockSpec((F_out_pad, 128), lambda i: (0, 0)),
            ],
            out_specs=(
                pl.BlockSpec((tn, F_out_pad), lambda i: (i, 0)),
                pl.BlockSpec((tn, 128), lambda i: (i, 0)),
            ),
        ),
        compiler_params=pltpu.CompilerParams(
            dimension_semantics=("parallel",),
            vmem_limit_bytes=vmem_limit,
        ),
    )(x_flat, W_p, a_pack)

    h_p = h_flat[:rows].reshape(B, N_pad, F_out_pad)   # bf16 projected features
    f_p = f_flat[:rows].reshape(B, N_pad, 128)         # f32, col0=f1 col1=f2
    f_t = jnp.swapaxes(f_p, 1, 2)                      # (B, 128, N_pad): f2 lane-major

    # ---- stage 2: tiled attention + online softmax, empty tiles skipped ----
    kernel = _make_attn_kernel(float(alpha), bool(concat), score_dtype)
    out_p = pl.pallas_call(
        kernel,
        out_shape=jax.ShapeDtypeStruct((B, N_pad, F_out_pad), jnp.bfloat16),
        grid_spec=pltpu.PrefetchScalarGridSpec(
            num_scalar_prefetch=1,                 # block-has-edges bitmap (SMEM)
            grid=(B, N_pad // tq, N_pad // tk),
            in_specs=[
                pl.BlockSpec((1, tq, 128), lambda b, qi, ki, bm: (b, qi, 0)),
                pl.BlockSpec((1, 128, tk), lambda b, qi, ki, bm: (b, 0, ki)),
                pl.BlockSpec((1, tq, tk), lambda b, qi, ki, bm: (b, qi, ki)),
                pl.BlockSpec((1, tk, F_out_pad), lambda b, qi, ki, bm: (b, ki, 0)),
            ],
            out_specs=pl.BlockSpec((1, tq, F_out_pad),
                                   lambda b, qi, ki, bm: (b, qi, 0)),
            scratch_shapes=[
                pltpu.VMEM((tq, 1), jnp.float32),           # running max
                pltpu.VMEM((tq, 1), jnp.float32),           # running sum
                pltpu.VMEM((tq, F_out_pad), jnp.float32),   # output accumulator
            ],
        ),
        compiler_params=pltpu.CompilerParams(
            # (B, q-tiles) parallel so both v7x TensorCores get work; k is the
            # online-softmax reduction axis.
            dimension_semantics=("parallel", "parallel", "arbitrary"),
            vmem_limit_bytes=vmem_limit,
        ),
    )(bitmap, f_p, f_t, adj_p, h_p)

    return out_p[:, :N, :F_out]


# ---------------------------------------------------------------------------
# Reference + test harness
# ---------------------------------------------------------------------------
def _reference(x, adj, W, a, alpha, concat):
    F_out = W.shape[1]
    h = jnp.einsum("bnf,fo->bno", x, W)
    f1 = jnp.einsum("bno,ok->bnk", h, a[:F_out])        # (B, N, 1)
    f2 = jnp.einsum("bno,ok->bnk", h, a[F_out:])        # (B, N, 1)
    e = f1 + jnp.swapaxes(f2, 1, 2)                     # (B, N, N)
    e = jnp.where(e > 0, e, alpha * e)
    att = jnp.where(adj > 0, e, _NEG_INF)
    att = jax.nn.softmax(att, axis=2)
    h_prime = jnp.einsum("bnm,bmo->bno", att, h)
    return jax.nn.elu(h_prime) if concat else h_prime


def xavier_uniform(key, shape, gain):
    fan_in, fan_out = shape[0], shape[1]
    bound = gain * math.sqrt(6.0 / (fan_in + fan_out))
    return jax.random.uniform(key, shape, jnp.float32, -bound, bound)


if __name__ == "__main__":
    key = jax.random.PRNGKey(0)
    k1, k2, k3, k4, k5 = jax.random.split(key, 5)
    alpha = 0.2
    # bf16 MXU operands, bf16 score chain (v6e/v7x), bf16 writeback and the
    # approx reciprocal -> loose tolerance vs the pure-f32 reference.
    ATOL = RTOL = 1e-1

    # --- test 1: small dense-ish graph, concat=True (ELU path) --------------
    B, N, F_in, F_out = 2, 16, 8, 32
    x = jax.random.normal(k1, (B, N, F_in), jnp.float32)
    adj = (jax.random.uniform(k2, (B, N, N)) < 0.4).astype(jnp.float32)
    adj = jnp.maximum(adj, jnp.eye(N, dtype=jnp.float32)[None])   # self-loops
    W = xavier_uniform(k3, (F_in, F_out), gain=1.414)
    a = xavier_uniform(k4, (2 * F_out, 1), gain=1.414)

    out = jax.block_until_ready(
        gat_forward(x, adj, W, a, alpha=alpha, concat=True))
    ref = _reference(x, adj, W, a, alpha, True)
    assert out.shape == (B, N, F_out)
    err = jnp.max(jnp.abs(out.astype(jnp.float32) - ref))
    assert jnp.allclose(out.astype(jnp.float32), ref, atol=ATOL, rtol=RTOL), (
        f"test1 max abs err {err}")

    # --- test 2: banded graph over multiple 128-tiles; exercises the
    #     scalar-prefetched empty-tile skip path; concat=False ---------------
    B2, N2 = 1, 300
    x2 = jax.random.normal(k5, (B2, N2, F_in), jnp.float32)
    idx = jnp.arange(N2)
    adj2 = (jnp.abs(idx[:, None] - idx[None, :]) <= 8).astype(jnp.float32)[None]
    out2 = jax.block_until_ready(
        gat_forward(x2, adj2, W, a, alpha=alpha, concat=False, max_tile=128))
    ref2 = _reference(x2, adj2, W, a, alpha, False)
    assert out2.shape == (B2, N2, F_out)
    err2 = jnp.max(jnp.abs(out2.astype(jnp.float32) - ref2))
    assert jnp.allclose(out2.astype(jnp.float32), ref2, atol=ATOL, rtol=RTOL), (
        f"test2 max abs err {err2}")

    print("KERNEL_OK")
</pallas_src>

<mosaic_0001>
module attributes {stable_mosaic.version = 11 : i64} {
  func.func @_proj_kernel(%arg0: i32, %arg1: memref<256x128xbf16, #tpu.memory_space<vmem>>, %arg2: memref<128x128xbf16, #tpu.memory_space<vmem>>, %arg3: memref<128x128xbf16, #tpu.memory_space<vmem>>, %arg4: memref<256x128xbf16, #tpu.memory_space<vmem>>, %arg5: memref<256x128xf32, #tpu.memory_space<vmem>>) attributes {dimension_semantics = [#tpu.dimension_semantics<parallel>], iteration_bounds = array<i64: 1>, scalar_prefetch = 0 : i64, scratch_operands = 0 : i64, tpu.core_type = #tpu.core_type<tc>, window_params = [{transform_indices = @transform_0, window_bounds = array<i64: 256, 128>}, {pipeline_mode = #tpu.pipeline_mode<synchronous>, transform_indices = @transform_1, window_bounds = array<i64: 128, 128>}, {pipeline_mode = #tpu.pipeline_mode<synchronous>, transform_indices = @transform_2, window_bounds = array<i64: 128, 128>}, {transform_indices = @transform_3, window_bounds = array<i64: 256, 128>}, {transform_indices = @transform_4, window_bounds = array<i64: 256, 128>}]} {
    %c0 = arith.constant 0 : index
    %c0_0 = arith.constant 0 : index
    %0 = vector.load %arg1[%c0, %c0_0] : memref<256x128xbf16, #tpu.memory_space<vmem>>, vector<256x128xbf16>
    %c0_1 = arith.constant 0 : index
    %c0_2 = arith.constant 0 : index
    %1 = vector.load %arg2[%c0_1, %c0_2] : memref<128x128xbf16, #tpu.memory_space<vmem>>, vector<128x128xbf16>
    %cst = arith.constant dense<0.000000e+00> : vector<256x128xf32>
    %2 = tpu.matmul %0, %1, %cst {dimension_numbers = #tpu.dot_dimension_numbers<[1], [0], [0], [1], [0, 0, 1, 1], [], []>} : vector<256x128xbf16>, vector<128x128xbf16>, vector<256x128xf32> -> vector<256x128xf32>
    %3 = arith.truncf %2 : vector<256x128xf32> to vector<256x128xbf16>
    %c0_3 = arith.constant 0 : index
    %c0_4 = arith.constant 0 : index
    %4 = vector.load %arg4[%c0_3, %c0_4] : memref<256x128xbf16, #tpu.memory_space<vmem>>, vector<256x128xbf16>
    tpu.vector_store %arg4[%c0_3, %c0_4], %3 {strides = array<i32>} : memref<256x128xbf16, #tpu.memory_space<vmem>>, vector<256x128xbf16>,
    %c0_5 = arith.constant 0 : index
    %c0_6 = arith.constant 0 : index
    %5 = vector.load %arg3[%c0_5, %c0_6] : memref<128x128xbf16, #tpu.memory_space<vmem>>, vector<128x128xbf16>
    %cst_7 = arith.constant dense<0.000000e+00> : vector<256x128xf32>
    %6 = tpu.matmul %3, %5, %cst_7 {dimension_numbers = #tpu.dot_dimension_numbers<[1], [0], [0], [1], [0, 0, 1, 1], [], []>} : vector<256x128xbf16>, vector<128x128xbf16>, vector<256x128xf32> -> vector<256x128xf32>
    %c0_8 = arith.constant 0 : index
    %c0_9 = arith.constant 0 : index
    %7 = vector.load %arg5[%c0_8, %c0_9] : memref<256x128xf32, #tpu.memory_space<vmem>>, vector<256x128xf32>
    tpu.vector_store %arg5[%c0_8, %c0_9], %6 {strides = array<i32>} : memref<256x128xf32, #tpu.memory_space<vmem>>, vector<256x128xf32>,
    return
  }
  func.func @transform_0(%arg0: i32) -> (i32, i32) {
    %c0_i32 = arith.constant 0 : i32
    %c0_i32_0 = arith.constant 0 : i32
    return %arg0, %c0_i32 : i32, i32
  }
  func.func @transform_1(%arg0: i32) -> (i32, i32) {
    %c0_i32 = arith.constant 0 : i32
    %c0_i32_0 = arith.constant 0 : i32
    %c0_i32_1 = arith.constant 0 : i32
    return %c0_i32, %c0_i32_0 : i32, i32
  }
  func.func @transform_2(%arg0: i32) -> (i32, i32) {
    %c0_i32 = arith.constant 0 : i32
    %c0_i32_0 = arith.constant 0 : i32
    %c0_i32_1 = arith.constant 0 : i32
    return %c0_i32, %c0_i32_0 : i32, i32
  }
  func.func @transform_3(%arg0: i32) -> (i32, i32) {
    %c0_i32 = arith.constant 0 : i32
    %c0_i32_0 = arith.constant 0 : i32
    return %arg0, %c0_i32 : i32, i32
  }
  func.func @transform_4(%arg0: i32) -> (i32, i32) {
    %c0_i32 = arith.constant 0 : i32
    %c0_i32_0 = arith.constant 0 : i32
    return %arg0, %c0_i32 : i32, i32
  }
}

</mosaic_0001>

<bundles_post_ra>
// kernel: tpu_custom_call.1
= control target key start
LH: loop header
LB: loop body
LE: loop exit
PB: predicated region body
PF: predicated region fallthrough
CT: control target
= control target key end

     0   :  { %10 = vsyncpa [#allocation3], 0  ;;  %s1471_s0 = inlined_call_operand.hbm [shape: bf16[256,128], index: 0, kind: input, shape index: {}]   ;;  %s1472_s1 = inlined_call_operand.hbm [shape: bf16[128,128], index: 1, kind: input, shape index: {}]   ;;  %s1473_s2 = inlined_call_operand.hbm [shape: bf16[128,128], index: 2, kind: input, shape index: {}]   ;;  %s1474_s3 = inlined_call_operand.hbm [shape: bf16[256,128], index: 3, kind: output, shape index: {0}]   ;;  %s1475_s4 = inlined_call_operand.hbm [shape: f32[256,128], index: 4, kind: output, shape index: {1}]  }
   0x1   :  { %11 = vsyncpa [#allocation6], 0 }
   0x2   :  { %12 = vsyncpa [#allocation4], 0 }
   0x3   :  { %13 = vsyncpa [#allocation10], 0  ;;  %s1358_s15 = smov [#allocation5]   ;;  %s1359_s17 = smov [#allocation2]  }
   0x4   :  { %s31_s16 = sshll.u32 %s1358_s15, 4  ;;  %s19_s18 = sshll.u32 %s1359_s17, 4  ;;  %s32_s16 = int_to_ptr.vmem [resolvable:$true] %s31_s16  ;;  %s1392_s18 = int_to_ptr.vmem [resolvable:$true] %s19_s18 }
   0x5   :  { %s1240_s21 = scalar_lea.hbm %s1472_s1, 1024 }
   0x6   :  { %p1241_p0 = scmp.ne.s32.totalorder %s1472_s1, %s1240_s21  ;;  %p1244_p1 = scmp.lt.u32.totalorder %s1240_s21, %s1472_s1 }
   0x8   :  { %p1246_p2 = pnand %p1244_p1, %p1241_p0 }
   0xa   :  { %1249 = shalt.err (!%p1246_p2)
}
   0xb   :  { %s1250_s26 = scalar_lea.vmem %s32_s16, 1024  ;;  %p1255_p4 = scmp.lt.s32.totalorder %s32_s16, %s32_s16 }
   0xc   :  { %p1251_p3 = scmp.ne.s32.totalorder %s32_s16, %s1250_s26  ;;  %p1256_p5 = scmp.lt.s32.totalorder %s1250_s26, %s1250_s26 }
   0xe   :  { %p1257_p6 = por %p1256_p5, %p1255_p4 }
  0x10   :  { %p1258_p7 = pnand %p1257_p6, %p1251_p3 }
  0x12   :  { %1261 = shalt.err (!%p1258_p7)
}
  0x13   :  { %s1360_s27 = smov 64   ;;  %s1361_s28 = smov 4  }
  0x14   :  { %37 = dma.hbm_to_vmem [thread:$0]  %s1472_s1, 1024, %s32_s16, [#allocation6], %s1360_s27, %s1360_s27, %s1361_s28  }
  0x15   :  { %s1262_s7 = scalar_lea.hbm %s1471_s0, 2048 }
  0x16   :  { %p1263_p8 = scmp.ne.s32.totalorder %s1471_s0, %s1262_s7  ;;  %p1266_p9 = scmp.lt.u32.totalorder %s1262_s7, %s1471_s0 }
  0x18   :  { %p1268_p10 = pnand %p1266_p9, %p1263_p8 }
  0x1a   :  { %1271 = shalt.err (!%p1268_p10)
}
  0x1b   :  { %s1272_s12 = scalar_lea.vmem %s1392_s18, 2048  ;;  %p1277_p12 = scmp.lt.s32.totalorder %s1392_s18, %s1392_s18 }
  0x1c   :  { %p1273_p11 = scmp.ne.s32.totalorder %s1392_s18, %s1272_s12  ;;  %p1278_p13 = scmp.lt.s32.totalorder %s1272_s12, %s1272_s12 }
  0x1e   :  { %p1279_p0 = por %p1278_p13, %p1277_p12 }
  0x20   :  { %p1280_p1 = pnand %p1279_p0, %p1273_p11 }
  0x22   :  { %1283 = shalt.err (!%p1280_p1)
}
  0x23   :  { %25 = dma.hbm_to_vmem [thread:$0]  %s1471_s0, 2048, %s1392_s18, [#allocation3], %s1360_s27, %s1360_s27, %s1361_s28  }
  0x24   :  { %s1362_s14 = smov [#allocation7]   ;;  %s1284_s19 = scalar_lea.hbm %s1473_s2, 1024 }
  0x25   :  { %s43_s15 = sshll.u32 %s1362_s14, 4  ;;  %p1285_p2 = scmp.ne.s32.totalorder %s1473_s2, %s1284_s19  ;;  %s44_s15 = int_to_ptr.vmem [resolvable:$true] %s43_s15 }
  0x26   :  { %p1288_p3 = scmp.lt.u32.totalorder %s1284_s19, %s1473_s2 }
  0x28   :  { %p1290_p4 = pnand %p1288_p3, %p1285_p2 }
  0x2a   :  { %1293 = shalt.err (!%p1290_p4)
}
  0x2b   :  { %s1294_s24 = scalar_lea.vmem %s44_s15, 1024  ;;  %p1299_p6 = scmp.lt.s32.totalorder %s44_s15, %s44_s15 }
  0x2c   :  { %p1295_p5 = scmp.ne.s32.totalorder %s44_s15, %s1294_s24  ;;  %p1300_p7 = scmp.lt.s32.totalorder %s1294_s24, %s1294_s24 }
  0x2e   :  { %p1301_p8 = por %p1300_p7, %p1299_p6 }
  0x30   :  { %p1302_p9 = pnand %p1301_p8, %p1295_p5 }
  0x32   :  { %1305 = shalt.err (!%p1302_p9)
}
  0x33   :  { %49 = dma.hbm_to_vmem [thread:$0]  %s1473_s2, 1024, %s44_s15, [#allocation6], %s1360_s27, %s1360_s27, %s1361_s28  }
  0x34   :  { %1350 = dma.done.wait [#allocation3], 2048  }
  0x35   :  { %1351 = vsyncadd [#allocation3], 4294965248 }
  0x36   :  { %1352 = dma.done.wait [#allocation6], 2048  }
  0x37   :  { %1353 = vsyncadd [#allocation6], 4294965248  ;;  %v1208_v0 = vld [vmem:[#allocation5] sm:$0xff]   ;;  %v1209_v1 = vld [vmem:[#allocation5 + $0x8] sm:$0xff]   ;;  %s1363_s2 = smov [#allocation8]  }
  0x38   :  { %1103 = vmatprep.subr.bf16.mxu0 %v1208_v0  ;;  %v1210_v2 = vld [vmem:[#allocation5 + $0x10] sm:$0xff]   ;;  %v1211_v3 = vld [vmem:[#allocation5 + $0x18] sm:$0xff]   ;;  %v1216_v4 = vld [vmem:[#allocation2] sm:$0xff]   ;;  %s835_s25 = sshll.u32 %s1363_s2, 4  ;;  %s836_s25 = int_to_ptr.vmem [resolvable:$true] %s835_s25 }
  0x39   :  { %1104 = vmatpush3.bf16.msra.mxu0 %v1208_v0  ;;  %1119 = vmatprep.mubr.bf16.mxu0 %v1216_v4  ;;  %v1212_v5 = vld [vmem:[#allocation5 + $0x20] sm:$0xff]   ;;  %v1213_v6 = vld [vmem:[#allocation5 + $0x28] sm:$0xff]   ;;  %v1214_v7 = vld [vmem:[#allocation5 + $0x30] sm:$0xff]   ;;  %s1306_s26 = scalar_lea.vmem %s836_s25, 2048  ;;  %p1311_p11 = scmp.lt.s32.totalorder %s836_s25, %s836_s25 }
  0x3a   :  { %1105 = vmatprep.subr.bf16.mxu0 %v1209_v1  ;;  %v1215_v8 = vld [vmem:[#allocation5 + $0x38] sm:$0xff]   ;;  %v1232_v9 = vld [vmem:[#allocation7] sm:$0xff]   ;;  %v1233_v10 = vld [vmem:[#allocation7 + $0x8] sm:$0xff]   ;;  %p1307_p10 = scmp.ne.s32.totalorder %s836_s25, %s1306_s26  ;;  %p1312_p12 = scmp.lt.s32.totalorder %s1306_s26, %s1306_s26 }
  0x3b   :  { %1151 = vmatprep.subr.bf16.mxu1 %v1232_v9  ;;  %v1234_v11 = vld [vmem:[#allocation7 + $0x10] sm:$0xff]   ;;  %v1217_v12 = vld [vmem:[#allocation2 + $0x8] sm:$0xff]   ;;  %v1235_v14 = vld [vmem:[#allocation7 + $0x18] sm:$0xff]  }
  0x3c   :  { %1152 = vmatpush3.bf16.msra.mxu1 %v1232_v9  ;;  %v1218_v13 = vld [vmem:[#allocation2 + $0x10] sm:$0xff]   ;;  %v1236_v15 = vld [vmem:[#allocation7 + $0x20] sm:$0xff]   ;;  %v1219_v16 = vld [vmem:[#allocation2 + $0x18] sm:$0xff]   ;;  %p1313_p13 = por %p1312_p12, %p1311_p11 }
  0x3d   :  { %1106 = vmatpush3.bf16.msra.mxu0 %v1209_v1  ;;  %1153 = vmatprep.subr.bf16.mxu1 %v1233_v10  ;;  %v1220_v17 = vld [vmem:[#allocation2 + $0x20] sm:$0xff]   ;;  %v1237_v18 = vld [vmem:[#allocation7 + $0x28] sm:$0xff]   ;;  %v1238_v19 = vld [vmem:[#allocation7 + $0x30] sm:$0xff]  }
  0x3e   :  { %1107 = vmatprep.subr.bf16.mxu0 %v1210_v2  ;;  %v1221_v20 = vld [vmem:[#allocation2 + $0x28] sm:$0xff]   ;;  %v1222_v21 = vld [vmem:[#allocation2 + $0x30] sm:$0xff]   ;;  %v1223_v22 = vld [vmem:[#allocation2 + $0x38] sm:$0xff]   ;;  %p1314_p0 = pnand %p1313_p13, %p1307_p10 }
  0x3f   :  { %v1224_v23 = vld [vmem:[#allocation2 + $0x40] sm:$0xff]   ;;  %v1225_v24 = vld [vmem:[#allocation2 + $0x48] sm:$0xff]   ;;  %v1226_v25 = vld [vmem:[#allocation2 + $0x50] sm:$0xff]  }
  0x40   :  { %1154 = vmatpush3.bf16.msra.mxu1 %v1233_v10  ;;  %v1227_v26 = vld [vmem:[#allocation2 + $0x58] sm:$0xff]   ;;  %v1228_v27 = vld [vmem:[#allocation2 + $0x60] sm:$0xff]   ;;  %v1229_v28 = vld [vmem:[#allocation2 + $0x68] sm:$0xff]  }
  0x41   :  { %1108 = vmatpush3.bf16.msra.mxu0 %v1210_v2  ;;  %1155 = vmatprep.subr.bf16.mxu1 %v1234_v11  ;;  %v1230_v29 = vld [vmem:[#allocation2 + $0x70] sm:$0xff]   ;;  %v1231_v30 = vld [vmem:[#allocation2 + $0x78] sm:$0xff]  }
  0x42   :  { %1109 = vmatprep.subr.bf16.mxu0 %v1211_v3  ;;  %v1239_v31 = vld [vmem:[#allocation7 + $0x38] sm:$0xff]  }
  0x44   :  { %1156 = vmatpush3.bf16.msra.mxu1 %v1234_v11 }
  0x45   :  { %1110 = vmatpush3.bf16.msra.mxu0 %v1211_v3  ;;  %1157 = vmatprep.subr.bf16.mxu1 %v1235_v14 }
  0x46   :  { %1111 = vmatprep.subr.bf16.mxu0 %v1212_v5 }
  0x48   :  { %1158 = vmatpush3.bf16.msra.mxu1 %v1235_v14 }
  0x49   :  { %1112 = vmatpush3.bf16.msra.mxu0 %v1212_v5  ;;  %1159 = vmatprep.subr.bf16.mxu1 %v1236_v15 }
  0x4a   :  { %1113 = vmatprep.subr.bf16.mxu0 %v1213_v6 }
  0x4c   :  { %1160 = vmatpush3.bf16.msra.mxu1 %v1236_v15 }
  0x4d   :  { %1114 = vmatpush3.bf16.msra.mxu0 %v1213_v6  ;;  %1161 = vmatprep.subr.bf16.mxu1 %v1237_v18 }
  0x4e   :  { %1115 = vmatprep.subr.bf16.mxu0 %v1214_v7 }
  0x50   :  { %1162 = vmatpush3.bf16.msra.mxu1 %v1237_v18 }
  0x51   :  { %1116 = vmatpush3.bf16.msra.mxu0 %v1214_v7  ;;  %1163 = vmatprep.subr.bf16.mxu1 %v1238_v19 }
  0x52   :  { %1117 = vmatprep.subr.bf16.mxu0 %v1215_v8 }
  0x54   :  { %1164 = vmatpush3.bf16.msra.mxu1 %v1238_v19 }
  0x55   :  { %1118 = vmatpush3.bf16.msra.mxu0 %v1215_v8  ;;  %1165 = vmatprep.subr.bf16.mxu1 %v1239_v31 }
  0x58   :  { %1120 = vmatmul.mubr.bf16.vlgmr.msra.gmra.mrb[0].mxu0 %v1217_v12  ;;  %1166 = vmatpush3.bf16.msra.mxu1 %v1239_v31 }
  0x59   :  { %1123 = vmatprep.mubr.bf16.mxu0 %v1218_v13 }
  0x60   :  { %1124 = vmatmul.mubr.bf16.gmra.mrb[4].mxu0 %v1219_v16 }
  0x61   :  { %1127 = vmatprep.mubr.bf16.mxu0 %v1220_v17 }
  0x68   :  { %1128 = vmatmul.mubr.bf16.gmra.mrb[8].mxu0 %v1221_v20 }
  0x69   :  { %1131 = vmatprep.mubr.bf16.mxu0 %v1222_v21 }
  0x70   :  { %1132 = vmatmul.mubr.bf16.gmra.mrb[12].mxu0 %v1223_v22 }
  0x71   :  { %1135 = vmatprep.mubr.bf16.mxu0 %v1224_v23 }
  0x78   :  { %1136 = vmatmul.mubr.bf16.gmra.mrb[16].mxu0 %v1225_v24 }
  0x79   :  { %1139 = vmatprep.mubr.bf16.mxu0 %v1226_v25 }
  0x80   :  { %1140 = vmatmul.mubr.bf16.gmra.mrb[20].mxu0 %v1227_v26 }
  0x81   :  { %1143 = vmatprep.mubr.bf16.mxu0 %v1228_v27 }
  0x88   :  { %1144 = vmatmul.mubr.bf16.gmra.mrb[24].mxu0 %v1229_v28 }
  0x89   :  { %1147 = vmatprep.mubr.bf16.mxu0 %v1230_v29 }
  0x90   :  { %1148 = vmatmul.mubr.bf16.gmra.mrb[28].mxu0 %v1231_v30 }
 0x12b   :  { %v1121_v32 = vpop.f32.mrb[0].mxu0 }
 0x12c   :  { %v286_v33 = vpop.f32.mrb[1].mxu0 }
 0x12d   :  { %v1122_v34 = vpop.f32.mrb[2].mxu0 }
 0x12e   :  { %v414_v35 = vpack.c.bf16 %v1122_v34, %v1121_v32  ;;  %v289_v36 = vpop.f32.mrb[3].mxu0 }
 0x12f   :  { %v413_v37 = vpack.c.bf16 %v289_v36, %v286_v33 }
 0x130   :  { %1040 = vst [vmem:[#allocation8 + $0x8] sm:$0xff] %v414_v35  }
 0x131   :  { %964 = vst [vmem:[#allocation8] sm:$0xff] %v413_v37   ;;  %1167 = vmatprep.mubr.bf16.mxu1 %v413_v37 }
 0x132   :  { %1168 = vmatmul.mubr.bf16.vlgmr.msra.gmra.mrb[0].mxu1 %v414_v35 }
 0x133   :  { %v1125_v38 = vpop.f32.mrb[4].mxu0 }
 0x134   :  { %v302_v39 = vpop.f32.mrb[5].mxu0 }
 0x135   :  { %v1126_v40 = vpop.f32.mrb[6].mxu0 }
 0x136   :  { %v416_v41 = vpack.c.bf16 %v1126_v40, %v1125_v38  ;;  %v305_v42 = vpop.f32.mrb[7].mxu0 }
 0x137   :  { %v415_v43 = vpack.c.bf16 %v305_v42, %v302_v39 }
 0x138   :  { %1042 = vst [vmem:[#allocation8 + $0x18] sm:$0xff] %v416_v41  }
 0x139   :  { %1041 = vst [vmem:[#allocation8 + $0x10] sm:$0xff] %v415_v43   ;;  %1171 = vmatprep.mubr.bf16.mxu1 %v415_v43 }
 0x13a   :  { %1172 = vmatmul.mubr.bf16.gmra.mrb[4].mxu1 %v416_v41 }
 0x13b   :  { %v1129_v44 = vpop.f32.mrb[8].mxu0 }
 0x13c   :  { %v318_v45 = vpop.f32.mrb[9].mxu0 }
 0x13d   :  { %v1130_v46 = vpop.f32.mrb[10].mxu0 }
 0x13e   :  { %v418_v47 = vpack.c.bf16 %v1130_v46, %v1129_v44  ;;  %v321_v48 = vpop.f32.mrb[11].mxu0 }
 0x13f   :  { %v417_v49 = vpack.c.bf16 %v321_v48, %v318_v45 }
 0x140   :  { %1044 = vst [vmem:[#allocation8 + $0x28] sm:$0xff] %v418_v47  }
 0x141   :  { %1043 = vst [vmem:[#allocation8 + $0x20] sm:$0xff] %v417_v49   ;;  %1175 = vmatprep.mubr.bf16.mxu1 %v417_v49 }
 0x142   :  { %1176 = vmatmul.mubr.bf16.gmra.mrb[8].mxu1 %v418_v47 }
 0x143   :  { %v1133_v50 = vpop.f32.mrb[12].mxu0 }
 0x144   :  { %v334_v51 = vpop.f32.mrb[13].mxu0 }
 0x145   :  { %v1134_v52 = vpop.f32.mrb[14].mxu0 }
 0x146   :  { %v420_v53 = vpack.c.bf16 %v1134_v52, %v1133_v50  ;;  %v337_v54 = vpop.f32.mrb[15].mxu0 }
 0x147   :  { %v419_v55 = vpack.c.bf16 %v337_v54, %v334_v51 }
 0x148   :  { %1046 = vst [vmem:[#allocation8 + $0x38] sm:$0xff] %v420_v53  }
 0x149   :  { %1045 = vst [vmem:[#allocation8 + $0x30] sm:$0xff] %v419_v55   ;;  %1179 = vmatprep.mubr.bf16.mxu1 %v419_v55 }
 0x14a   :  { %1180 = vmatmul.mubr.bf16.gmra.mrb[12].mxu1 %v420_v53 }
 0x14b   :  { %v1137_v56 = vpop.f32.mrb[16].mxu0 }
 0x14c   :  { %v350_v57 = vpop.f32.mrb[17].mxu0 }
 0x14d   :  { %v1138_v58 = vpop.f32.mrb[18].mxu0 }
 0x14e   :  { %v422_v59 = vpack.c.bf16 %v1138_v58, %v1137_v56  ;;  %v353_v60 = vpop.f32.mrb[19].mxu0 }
 0x14f   :  { %v421_v61 = vpack.c.bf16 %v353_v60, %v350_v57 }
 0x150   :  { %1048 = vst [vmem:[#allocation8 + $0x48] sm:$0xff] %v422_v59  }
 0x151   :  { %1047 = vst [vmem:[#allocation8 + $0x40] sm:$0xff] %v421_v61   ;;  %1183 = vmatprep.mubr.bf16.mxu1 %v421_v61 }
 0x152   :  { %1184 = vmatmul.mubr.bf16.gmra.mrb[16].mxu1 %v422_v59 }
 0x153   :  { %v1141_v62 = vpop.f32.mrb[20].mxu0 }
 0x154   :  { %v366_v63 = vpop.f32.mrb[21].mxu0 }
 0x155   :  { %v1142_v0 = vpop.f32.mrb[22].mxu0 }
 0x156   :  { %v424_v1 = vpack.c.bf16 %v1142_v0, %v1141_v62  ;;  %v369_v2 = vpop.f32.mrb[23].mxu0 }
 0x157   :  { %v423_v3 = vpack.c.bf16 %v369_v2, %v366_v63 }
 0x158   :  { %1050 = vst [vmem:[#allocation8 + $0x58] sm:$0xff] %v424_v1  }
 0x159   :  { %1049 = vst [vmem:[#allocation8 + $0x50] sm:$0xff] %v423_v3   ;;  %1187 = vmatprep.mubr.bf16.mxu1 %v423_v3 }
 0x15a   :  { %1188 = vmatmul.mubr.bf16.gmra.mrb[20].mxu1 %v424_v1 }
 0x15b   :  { %v1145_v4 = vpop.f32.mrb[24].mxu0 }
 0x15c   :  { %v382_v5 = vpop.f32.mrb[25].mxu0 }
 0x15d   :  { %v1146_v6 = vpop.f32.mrb[26].mxu0 }
 0x15e   :  { %v426_v7 = vpack.c.bf16 %v1146_v6, %v1145_v4  ;;  %v385_v8 = vpop.f32.mrb[27].mxu0 }
 0x15f   :  { %v425_v9 = vpack.c.bf16 %v385_v8, %v382_v5 }
 0x160   :  { %1052 = vst [vmem:[#allocation8 + $0x68] sm:$0xff] %v426_v7  }
 0x161   :  { %1051 = vst [vmem:[#allocation8 + $0x60] sm:$0xff] %v425_v9   ;;  %1191 = vmatprep.mubr.bf16.mxu1 %v425_v9 }
 0x162   :  { %1192 = vmatmul.mubr.bf16.gmra.mrb[24].mxu1 %v426_v7 }
 0x163   :  { %v1149_v10 = vpop.f32.mrb[28].mxu0 }
 0x164   :  { %v398_v11 = vpop.f32.mrb[29].mxu0 }
 0x165   :  { %v1150_v12 = vpop.f32.mrb[30].mxu0 }
 0x166   :  { %v428_v13 = vpack.c.bf16 %v1150_v12, %v1149_v10  ;;  %v401_v14 = vpop.f32.mrb[31].mxu0 }
 0x167   :  { %v427_v15 = vpack.c.bf16 %v401_v14, %v398_v11 }
 0x168   :  { %1054 = vst [vmem:[#allocation8 + $0x78] sm:$0xff] %v428_v13  }
 0x169   :  { %1053 = vst [vmem:[#allocation8 + $0x70] sm:$0xff] %v427_v15   ;;  %1195 = vmatprep.mubr.bf16.mxu1 %v427_v15 }
 0x16a   :  { %1196 = vmatmul.mubr.bf16.gmra.mrb[28].mxu1 %v428_v13 }
 0x16b   :  { %1317 = shalt.err (!%p1314_p0)
}
 0x16c   :  { %s1318_s5 = scalar_lea.hbm %s1474_s3, 2048 }
 0x16d   :  { %p1319_p1 = scmp.ne.s32.totalorder %s1474_s3, %s1318_s5  ;;  %p1322_p2 = scmp.lt.u32.totalorder %s1318_s5, %s1474_s3 }
 0x16f   :  { %p1324_p3 = pnand %p1322_p2, %p1319_p1 }
 0x171   :  { %1327 = shalt.err (!%p1324_p3)
}
 0x172   :  { %841 = dma.vmem_to_hbm [thread:$0]  %s836_s25, 2048, %s1474_s3, [#allocation4], %s1360_s27, %s1360_s27, %s1361_s28  }
 0x173   :  { %s1364_s3 = smov [#allocation9]  }
 0x174   :  { %s847_s27 = sshll.u32 %s1364_s3, 4  ;;  %s848_s27 = int_to_ptr.vmem [resolvable:$true] %s847_s27 }
 0x175   :  { %s1328_s28 = scalar_lea.vmem %s848_s27, 4096  ;;  %p1333_p5 = scmp.lt.s32.totalorder %s848_s27, %s848_s27 }
 0x176   :  { %p1329_p4 = scmp.ne.s32.totalorder %s848_s27, %s1328_s28  ;;  %p1334_p6 = scmp.lt.s32.totalorder %s1328_s28, %s1328_s28 }
 0x178   :  { %p1335_p7 = por %p1334_p6, %p1333_p5 }
 0x17a   :  { %p1336_p8 = pnand %p1335_p7, %p1329_p4 }
 0x205   :  { %v1169_v16 = vpop.f32.mrb[0].mxu1 }
 0x206   :  { %800 = vst [vmem:[#allocation9 + $0x10] sm:$0xff] %v1169_v16  ;;  %v671_v17 = vpop.f32.mrb[1].mxu1 }
 0x207   :  { %798 = vst [vmem:[#allocation9] sm:$0xff] %v671_v17  ;;  %v1170_v18 = vpop.f32.mrb[2].mxu1 }
 0x208   :  { %801 = vst [vmem:[#allocation9 + $0x18] sm:$0xff] %v1170_v18  ;;  %v674_v19 = vpop.f32.mrb[3].mxu1 }
 0x209   :  { %799 = vst [vmem:[#allocation9 + $0x8] sm:$0xff] %v674_v19 }
 0x20d   :  { %v1173_v20 = vpop.f32.mrb[4].mxu1 }
 0x20e   :  { %804 = vst [vmem:[#allocation9 + $0x30] sm:$0xff] %v1173_v20  ;;  %v687_v21 = vpop.f32.mrb[5].mxu1 }
 0x20f   :  { %802 = vst [vmem:[#allocation9 + $0x20] sm:$0xff] %v687_v21  ;;  %v1174_v22 = vpop.f32.mrb[6].mxu1 }
 0x210   :  { %805 = vst [vmem:[#allocation9 + $0x38] sm:$0xff] %v1174_v22  ;;  %v690_v23 = vpop.f32.mrb[7].mxu1 }
 0x211   :  { %803 = vst [vmem:[#allocation9 + $0x28] sm:$0xff] %v690_v23 }
 0x215   :  { %v1177_v24 = vpop.f32.mrb[8].mxu1 }
 0x216   :  { %808 = vst [vmem:[#allocation9 + $0x50] sm:$0xff] %v1177_v24  ;;  %v703_v25 = vpop.f32.mrb[9].mxu1 }
 0x217   :  { %806 = vst [vmem:[#allocation9 + $0x40] sm:$0xff] %v703_v25  ;;  %v1178_v26 = vpop.f32.mrb[10].mxu1 }
 0x218   :  { %809 = vst [vmem:[#allocation9 + $0x58] sm:$0xff] %v1178_v26  ;;  %v706_v27 = vpop.f32.mrb[11].mxu1 }
 0x219   :  { %807 = vst [vmem:[#allocation9 + $0x48] sm:$0xff] %v706_v27 }
 0x21d   :  { %v1181_v28 = vpop.f32.mrb[12].mxu1 }
 0x21e   :  { %812 = vst [vmem:[#allocation9 + $0x70] sm:$0xff] %v1181_v28  ;;  %v719_v29 = vpop.f32.mrb[13].mxu1 }
 0x21f   :  { %810 = vst [vmem:[#allocation9 + $0x60] sm:$0xff] %v719_v29  ;;  %v1182_v30 = vpop.f32.mrb[14].mxu1 }
 0x220   :  { %813 = vst [vmem:[#allocation9 + $0x78] sm:$0xff] %v1182_v30  ;;  %v722_v31 = vpop.f32.mrb[15].mxu1 }
 0x221   :  { %811 = vst [vmem:[#allocation9 + $0x68] sm:$0xff] %v722_v31 }
 0x225   :  { %v1185_v32 = vpop.f32.mrb[16].mxu1 }
 0x226   :  { %816 = vst [vmem:[#allocation9 + $0x90] sm:$0xff] %v1185_v32  ;;  %v735_v33 = vpop.f32.mrb[17].mxu1 }
 0x227   :  { %814 = vst [vmem:[#allocation9 + $0x80] sm:$0xff] %v735_v33  ;;  %v1186_v34 = vpop.f32.mrb[18].mxu1 }
 0x228   :  { %817 = vst [vmem:[#allocation9 + $0x98] sm:$0xff] %v1186_v34  ;;  %v738_v35 = vpop.f32.mrb[19].mxu1 }
 0x229   :  { %815 = vst [vmem:[#allocation9 + $0x88] sm:$0xff] %v738_v35 }
 0x22d   :  { %v1189_v36 = vpop.f32.mrb[20].mxu1 }
 0x22e   :  { %820 = vst [vmem:[#allocation9 + $0xb0] sm:$0xff] %v1189_v36  ;;  %v751_v37 = vpop.f32.mrb[21].mxu1 }
 0x22f   :  { %818 = vst [vmem:[#allocation9 + $0xa0] sm:$0xff] %v751_v37  ;;  %v1190_v38 = vpop.f32.mrb[22].mxu1 }
 0x230   :  { %821 = vst [vmem:[#allocation9 + $0xb8] sm:$0xff] %v1190_v38  ;;  %v754_v39 = vpop.f32.mrb[23].mxu1 }
 0x231   :  { %819 = vst [vmem:[#allocation9 + $0xa8] sm:$0xff] %v754_v39 }
 0x235   :  { %v1193_v40 = vpop.f32.mrb[24].mxu1 }
 0x236   :  { %824 = vst [vmem:[#allocation9 + $0xd0] sm:$0xff] %v1193_v40  ;;  %v767_v41 = vpop.f32.mrb[25].mxu1 }
 0x237   :  { %822 = vst [vmem:[#allocation9 + $0xc0] sm:$0xff] %v767_v41  ;;  %v1194_v42 = vpop.f32.mrb[26].mxu1 }
 0x238   :  { %825 = vst [vmem:[#allocation9 + $0xd8] sm:$0xff] %v1194_v42  ;;  %v770_v43 = vpop.f32.mrb[27].mxu1 }
 0x239   :  { %823 = vst [vmem:[#allocation9 + $0xc8] sm:$0xff] %v770_v43 }
 0x23d   :  { %v1197_v44 = vpop.f32.mrb[28].mxu1 }
 0x23e   :  { %828 = vst [vmem:[#allocation9 + $0xf0] sm:$0xff] %v1197_v44  ;;  %v783_v45 = vpop.f32.mrb[29].mxu1 }
 0x23f   :  { %826 = vst [vmem:[#allocation9 + $0xe0] sm:$0xff] %v783_v45  ;;  %v1198_v46 = vpop.f32.mrb[30].mxu1 }
 0x240   :  { %829 = vst [vmem:[#allocation9 + $0xf8] sm:$0xff] %v1198_v46  ;;  %v786_v47 = vpop.f32.mrb[31].mxu1 }
 0x241   :  { %827 = vst [vmem:[#allocation9 + $0xe8] sm:$0xff] %v786_v47 }
 0x242   :  { %1339 = shalt.err (!%p1336_p8)
}
 0x243   :  { %s1340_s13 = scalar_lea.hbm %s1475_s4, 4096 }
 0x244   :  { %p1341_p9 = scmp.ne.s32.totalorder %s1475_s4, %s1340_s13  ;;  %p1344_p10 = scmp.lt.u32.totalorder %s1340_s13, %s1475_s4 }
 0x246   :  { %p1346_p11 = pnand %p1344_p10, %p1341_p9 }
 0x248   :  { %1349 = shalt.err (!%p1346_p11)
}
 0x249   :  { %s1365_s19 = smov 128   ;;  %s1366_s20 = smov 8  }
 0x24a   :  { %853 = dma.vmem_to_hbm [thread:$0]  %s848_s27, 4096, %s1475_s4, [#allocation10], %s1365_s19, %s1365_s19, %s1366_s20  }
 0x24b   :  { %1354 = dma.done.wait [#allocation4], 2048  }
 0x24c   :  { %1355 = vsyncadd [#allocation4], 4294965248 }
 0x24d   :  { %1356 = dma.done.wait [#allocation10], 4096  }
 0x24e   :  { %1357 = vsyncadd [#allocation10], 4294963200 }
 0x24f   :  { %860 = vsyncpa [#allocation3], 1 }
 0x250   :  { %861 = vsyncpa [#allocation6], 1 }
 0x251   :  { %862 = vsyncpa [#allocation4], 1 }
 0x252   :  { %863 = vsyncpa [#allocation10], 1 }

</bundles_post_ra>
